<compile_context>
chip_gen: v7x
topology: tpu7x:2x2x1
jax: 0.10.0
libtpu: 0.0.40
codegen_flags: <defaults>
</compile_context>

<pallas_src>
import functools

import jax
import jax.numpy as jnp
from jax.experimental import pallas as pl
from jax.experimental.pallas import tpu as pltpu


def _round_up(n, m):
    return -(-n // m) * m


def _adapter_kernel(mask_ref, x_ref, w1_ref, b1_ref, w2_ref, b2_ref,
                    wp_ref, bp_ref, o_ref, xc_ref, h1c_ref):
    # mask_ref: (1, tT, 1)    f32   1.0 = valid frame, 0.0 = padding
    # x_ref   : (1, tT, C)    f32   raw input tile (natural channel width)
    # w1_ref  : (K, C,   C2p) bf16  conv1 weight per tap, BN1 scale folded
    # b1_ref  : (1, C2p)      f32   conv1 bias + BN1 shift (fused)
    # w2_ref  : (K, C2p, C4p) bf16  conv2 weight per tap, BN2 scale folded
    # b2_ref  : (1, C4p)      f32
    # wp_ref  : (C4p, Dp) bf16 ; bp_ref: (1, Dp) f32
    # o_ref   : (1, tT, Dp)   f32   lane-dense store (Dp % 128 == 0)
    # xc_ref  : (K-1, C)      f32   carry: last K-1 masked-x rows of prev tile
    # h1c_ref : (K-1, C2p)    f32   carry: last K-1 h1 rows of prev tile
    K = w1_ref.shape[0]
    H = K - 1
    tT = o_ref.shape[1]
    ti = pl.program_id(1)

    # First time tile of each batch element: the causal left padding is all
    # zeros (ConstantPad1d for conv1, and the zero h1 halo for conv2).
    @pl.when(ti == 0)
    def _():
        xc_ref[...] = jnp.zeros_like(xc_ref)
        h1c_ref[...] = jnp.zeros_like(h1c_ref)

    # masked_fill fused in-kernel (no masked copy of x ever hits HBM).
    x = x_ref[0] * mask_ref[0]                                    # (tT, C) f32

    # ---- causal conv1 (+ folded BN1 + ReLU): K per-tap accumulating matmuls
    xin = jnp.concatenate([xc_ref[...], x], axis=0)               # (tT+H, C)
    xin_b = xin.astype(jnp.bfloat16)
    acc1 = jnp.dot(xin_b[0:tT], w1_ref[0], preferred_element_type=jnp.float32)
    for k in range(1, K):
        acc1 = acc1 + jnp.dot(xin_b[k:k + tT], w1_ref[k],
                              preferred_element_type=jnp.float32)
    h1 = jnp.maximum(acc1 + b1_ref[0], 0.0)                       # (tT, C2p) f32

    # ---- causal conv2 (+ folded BN2 + ReLU), halo carried from previous tile
    h1in = jnp.concatenate([h1c_ref[...], h1], axis=0)            # (tT+H, C2p)
    h1in_b = h1in.astype(jnp.bfloat16)
    acc2 = jnp.dot(h1in_b[0:tT], w2_ref[0], preferred_element_type=jnp.float32)
    for k in range(1, K):
        acc2 = acc2 + jnp.dot(h1in_b[k:k + tT], w2_ref[k],
                              preferred_element_type=jnp.float32)
    h2 = jnp.maximum(acc2 + b2_ref[0], 0.0).astype(jnp.bfloat16)  # (tT, C4p)

    # ---- final Linear projection
    y = jnp.dot(h2, wp_ref[...], preferred_element_type=jnp.float32) + bp_ref[0]
    # TODO(synk): optionally store bf16 output to halve writeback on v5e/v6e.
    o_ref[0] = y.astype(o_ref.dtype)                              # lane-dense vst

    # ---- carry the exact causal halo to the next time tile
    if tT >= H:        # static; when there is a single tile the carry is unused
        xc_ref[...] = x[tT - H:, :]
        h1c_ref[...] = h1[tT - H:, :]


def cnn_adapter_forward(x, mask_pad, kparams):
    """x: (B, T, C) f32; mask_pad: (B, 1, T) bool. Returns ((B, T, D), mask_pad)."""
    B, T, C = x.shape
    K, D = kparams["K"], kparams["D"]
    C2p, C4p, Dp = kparams["C2p"], kparams["C4p"], kparams["Dp"]
    H = K - 1

    # Time tile: 512 rows is the v7x-safe choice (32 MiB scoped / 64 MiB physical
    # VMEM).  v5e/v6e (128 MiB VMEM) can raise this to 1024-2048 to further
    # amortize the ~0.35 us/step grid overhead.
    tT = T if T <= 512 else 512
    nT = pl.cdiv(T, tT)
    assert nT == 1 or (tT >= H and tT % 8 == 0), "time tile must cover the causal halo"

    # Tiny (B, T, 1) mask stream; masking itself happens in-kernel.
    mask_f = jnp.transpose(mask_pad, (0, 2, 1)).astype(x.dtype)   # (B, T, 1)

    const = lambda shape: pl.BlockSpec(shape, lambda b, t: (0,) * len(shape))
    # TODO(synk): on v7x, pipeline_mode=pl.Buffered(1) on these constant-index
    # weight blocks would drop their pointless second VMEM buffers.
    # TODO(synk): at the module's default sizes (C4=2048, D=4096) the projection
    # weight should additionally be tiled over D (and the tiny-T case could pack
    # several batch elements per grid step).

    # Re-derive the VMEM budget from the tile: double-buffered activation blocks
    # + resident weights + f32/bf16 intermediates, with headroom.
    nbytes = lambda a: a.size * jnp.dtype(a.dtype).itemsize
    w_bytes = sum(nbytes(kparams[k]) for k in ("w1", "b1", "w2", "b2", "wp", "bp"))
    act_bytes = tT * (C + 1 + Dp) * 4
    interm_bytes = (tT + H) * (C + C2p + 2 * C4p) * 6
    vmem_limit = int(min(2 * (w_bytes + act_bytes) + interm_bytes + (8 << 20),
                         100 << 20))

    out = pl.pallas_call(
        _adapter_kernel,
        out_shape=jax.ShapeDtypeStruct((B, T, Dp), x.dtype),
        grid_spec=pltpu.PrefetchScalarGridSpec(
            num_scalar_prefetch=0,
            grid=(B, nT),
            in_specs=[
                pl.BlockSpec((1, tT, 1), lambda b, t: (b, t, 0)),   # mask
                pl.BlockSpec((1, tT, C), lambda b, t: (b, t, 0)),   # x
                const((K, C, C2p)), const((1, C2p)),                # w1, b1
                const((K, C2p, C4p)), const((1, C4p)),              # w2, b2
                const((C4p, Dp)), const((1, Dp)),                   # wp, bp
            ],
            out_specs=pl.BlockSpec((1, tT, Dp), lambda b, t: (b, t, 0)),
            scratch_shapes=[
                pltpu.VMEM((H, C), jnp.float32),     # masked-x halo carry
                pltpu.VMEM((H, C2p), jnp.float32),   # h1 halo carry
            ],
        ),
        compiler_params=pltpu.CompilerParams(
            # Batch axis splits across v7x's two TensorCores; the time axis
            # carries the causal halo in scratch and therefore stays sequential.
            dimension_semantics=("parallel", "arbitrary"),
            vmem_limit_bytes=vmem_limit,
        ),
    )(mask_f, x, kparams["w1"], kparams["b1"], kparams["w2"], kparams["b2"],
      kparams["wp"], kparams["bp"])

    return out[:, :, :D], mask_pad


def make_params(key, enc_out_dim, llm_embed_dim, kernel_size):
    """Deterministic synthetic parameters mirroring the PyTorch module (eval mode)."""
    C, D, K = enc_out_dim, llm_embed_dim, kernel_size
    C2, C4 = 2 * C, 4 * C
    ks = jax.random.split(key, 16)
    u = lambda k, shape, s: jax.random.uniform(k, shape, jnp.float32, -s, s)

    def conv_bn(i, cin, cout):
        s = (1.0 / (cin * K)) ** 0.5
        w = u(ks[i + 0], (K, cin, cout), s)        # tap-major (K, Cin, Cout)
        b = u(ks[i + 1], (cout,), s)
        bn = dict(gamma=1.0 + 0.1 * u(ks[i + 2], (cout,), 1.0),
                  beta=0.1 * u(ks[i + 3], (cout,), 1.0),
                  mean=0.05 * u(ks[i + 4], (cout,), 1.0),
                  var=1.0 + 0.1 * jnp.abs(u(ks[i + 5], (cout,), 1.0)))
        return w, b, bn

    w1, b1, bn1 = conv_bn(0, C, C2)
    w2, b2, bn2 = conv_bn(6, C2, C4)
    s = (1.0 / C4) ** 0.5
    return dict(w1=w1, b1=b1, bn1=bn1, w2=w2, b2=b2, bn2=bn2,
                wp=u(ks[12], (C4, D), s), bp=u(ks[13], (D,), s))


def prepare_kernel_params(p):
    """Fold eval-mode BN into the conv weights (eps=1e-3, as the module sets
    explicitly), keep the per-tap (K, Cin, Cout) layout for the per-tap
    accumulating matmuls, zero-pad only the OUTPUT-channel lane dims to
    multiples of 128, and cast matmul weights to bf16 (f32 MXU accumulation)."""
    K, C, C2 = p["w1"].shape
    C4, D = p["wp"].shape
    C2p, C4p, Dp = (_round_up(n, 128) for n in (C2, C4, D))

    def fold(w, b, bn):
        # BN(conv(x) + b) = conv(x)*scale + ((b - mean)*scale + beta)
        scale = bn["gamma"] / jnp.sqrt(bn["var"] + 1e-3)   # module: eps=0.001
        return w * scale[None, None, :], (b - bn["mean"]) * scale + bn["beta"]

    w1s, sh1 = fold(p["w1"], p["b1"], p["bn1"])
    w2s, sh2 = fold(p["w2"], p["b2"], p["bn2"])
    pad_vec = lambda v, n: jnp.pad(v, (0, n - v.shape[0])).reshape(1, n).astype(jnp.float32)
    return dict(
        K=K, D=D, C2p=C2p, C4p=C4p, Dp=Dp,
        w1=jnp.pad(w1s, ((0, 0), (0, 0), (0, C2p - C2))).astype(jnp.bfloat16),
        b1=pad_vec(sh1, C2p),
        w2=jnp.pad(w2s, ((0, 0), (0, C2p - C2), (0, C4p - C4))).astype(jnp.bfloat16),
        b2=pad_vec(sh2, C4p),
        wp=jnp.pad(p["wp"], ((0, C4p - C4), (0, Dp - D))).astype(jnp.bfloat16),
        bp=pad_vec(p["bp"], Dp),
    )


def reference_forward(x, mask_pad, p):
    """Pure-JAX f32 reference of the PyTorch forward (BatchNorm in eval mode)."""
    K = p["w1"].shape[0]
    m = jnp.transpose(mask_pad.astype(x.dtype), (0, 2, 1))
    h = x * m

    def causal_conv(h, w, b):
        T = h.shape[1]
        hp = jnp.pad(h, ((0, 0), (K - 1, 0), (0, 0)))
        return sum(jnp.einsum("btc,cd->btd", hp[:, k:k + T, :], w[k])
                   for k in range(K)) + b

    def bn(h, s):
        return (h - s["mean"]) / jnp.sqrt(s["var"] + 1e-3) * s["gamma"] + s["beta"]

    h1 = jax.nn.relu(bn(causal_conv(h, p["w1"], p["b1"]), p["bn1"]))
    h2 = jax.nn.relu(bn(causal_conv(h1, p["w2"], p["b2"]), p["bn2"]))
    return jnp.einsum("btc,cd->btd", h2, p["wp"]) + p["bp"]


if __name__ == "__main__":
    # Small shapes consistent with the module's forward: x (B, T, enc_out_dim),
    # mask_pad (B, 1, T).  enc_out_dim=32, llm_embed_dim=64, kernel_size=5.
    B, T, C, D, K = 2, 8, 32, 64, 5

    key = jax.random.PRNGKey(0)
    kx, kp = jax.random.split(key)
    x = jax.random.normal(kx, (B, T, C), jnp.float32)
    # mask_pad: True = valid frame; last two frames of batch 1 are padding.
    lengths = jnp.array([T, T - 2])
    mask_pad = (jnp.arange(T)[None, :] < lengths[:, None]).reshape(B, 1, T)

    params = make_params(kp, C, D, K)
    kparams = prepare_kernel_params(params)

    fwd = jax.jit(functools.partial(cnn_adapter_forward, kparams=kparams))
    out, mask_out = fwd(x, mask_pad)
    jax.block_until_ready(out)

    ref = reference_forward(x, mask_pad, params)
    assert out.shape == (B, T, D) and out.dtype == jnp.float32
    assert bool(jnp.all(mask_out == mask_pad))
    # bf16 matmul operands with f32 accumulation -> compare against the f32
    # reference with a correspondingly relaxed tolerance.
    assert jnp.allclose(out, ref, atol=3e-2, rtol=3e-2), "mismatch vs reference"
    # TODO(synk): BatchNorm1d is modeled in inference mode only (running
    # statistics folded into the conv weights); training-mode batch statistics
    # are not modeled.
    print("KERNEL_OK")
</pallas_src>

<mosaic_0001>
module attributes {stable_mosaic.version = 11 : i64} {
  func.func @_adapter_kernel(%arg0: i32, %arg1: i32, %arg2: memref<1x8x1xf32, #tpu.memory_space<vmem>>, %arg3: memref<1x8x32xf32, #tpu.memory_space<vmem>>, %arg4: memref<5x32x128xbf16, #tpu.memory_space<vmem>>, %arg5: memref<1x128xf32, #tpu.memory_space<vmem>>, %arg6: memref<5x128x128xbf16, #tpu.memory_space<vmem>>, %arg7: memref<1x128xf32, #tpu.memory_space<vmem>>, %arg8: memref<128x128xbf16, #tpu.memory_space<vmem>>, %arg9: memref<1x128xf32, #tpu.memory_space<vmem>>, %arg10: memref<1x8x128xf32, #tpu.memory_space<vmem>>, %arg11: memref<4x32xf32, #tpu.memory_space<vmem>>, %arg12: memref<4x128xf32, #tpu.memory_space<vmem>>) attributes {dimension_semantics = [#tpu.dimension_semantics<parallel>, #tpu.dimension_semantics<arbitrary>], iteration_bounds = array<i64: 2, 1>, scalar_prefetch = 0 : i64, scratch_operands = 2 : i64, tpu.core_type = #tpu.core_type<tc>, window_params = [{transform_indices = @transform_0, window_bounds = array<i64: 1, 8, 1>}, {transform_indices = @transform_1, window_bounds = array<i64: 1, 8, 32>}, {pipeline_mode = #tpu.pipeline_mode<synchronous>, transform_indices = @transform_2, window_bounds = array<i64: 5, 32, 128>}, {pipeline_mode = #tpu.pipeline_mode<synchronous>, transform_indices = @transform_3, window_bounds = array<i64: 1, 128>}, {pipeline_mode = #tpu.pipeline_mode<synchronous>, transform_indices = @transform_4, window_bounds = array<i64: 5, 128, 128>}, {pipeline_mode = #tpu.pipeline_mode<synchronous>, transform_indices = @transform_5, window_bounds = array<i64: 1, 128>}, {pipeline_mode = #tpu.pipeline_mode<synchronous>, transform_indices = @transform_6, window_bounds = array<i64: 128, 128>}, {pipeline_mode = #tpu.pipeline_mode<synchronous>, transform_indices = @transform_7, window_bounds = array<i64: 1, 128>}, {transform_indices = @transform_8, window_bounds = array<i64: 1, 8, 128>}]} {
    %c0_i32 = arith.constant 0 : i32
    %0 = arith.cmpi eq, %arg1, %c0_i32 : i32
    %1 = arith.extui %0 : i1 to i32
    %c0_i32_0 = arith.constant 0 : i32
    %2 = arith.cmpi ne, %1, %c0_i32_0 : i32
    scf.if %2 {
      %cst_63 = arith.constant 0.000000e+00 : f32
      %92 = vector.broadcast %cst_63 : f32 to vector<4x32xf32>
      %c0_64 = arith.constant 0 : index
      %c0_65 = arith.constant 0 : index
      %93 = vector.load %arg11[%c0_64, %c0_65] : memref<4x32xf32, #tpu.memory_space<vmem>>, vector<4x32xf32>
      tpu.vector_store %arg11[%c0_64, %c0_65], %92 {strides = array<i32>} : memref<4x32xf32, #tpu.memory_space<vmem>>, vector<4x32xf32>,
      %cst_66 = arith.constant 0.000000e+00 : f32
      %94 = vector.broadcast %cst_66 : f32 to vector<4x128xf32>
      %c0_67 = arith.constant 0 : index
      %c0_68 = arith.constant 0 : index
      %95 = vector.load %arg12[%c0_67, %c0_68] : memref<4x128xf32, #tpu.memory_space<vmem>>, vector<4x128xf32>
      tpu.vector_store %arg12[%c0_67, %c0_68], %94 {strides = array<i32>} : memref<4x128xf32, #tpu.memory_space<vmem>>, vector<4x128xf32>,
    } else {
    }
    %c0 = arith.constant 0 : index
    %c0_1 = arith.constant 0 : index
    %c0_2 = arith.constant 0 : index
    %3 = vector.load %arg3[%c0, %c0_1, %c0_2] : memref<1x8x32xf32, #tpu.memory_space<vmem>>, vector<1x8x32xf32>
    %4 = vector.shape_cast %3 : vector<1x8x32xf32> to vector<8x32xf32>
    %c0_3 = arith.constant 0 : index
    %c0_4 = arith.constant 0 : index
    %c0_5 = arith.constant 0 : index
    %5 = vector.load %arg2[%c0_3, %c0_4, %c0_5] : memref<1x8x1xf32, #tpu.memory_space<vmem>>, vector<1x8x1xf32>
    %6 = vector.shape_cast %5 : vector<1x8x1xf32> to vector<8x1xf32>
    %7 = vector.broadcast %6 : vector<8x1xf32> to vector<8x32xf32>
    %8 = arith.mulf %4, %7 : vector<8x32xf32>
    %c0_6 = arith.constant 0 : index
    %c0_7 = arith.constant 0 : index
    %9 = vector.load %arg11[%c0_6, %c0_7] : memref<4x32xf32, #tpu.memory_space<vmem>>, vector<4x32xf32>
    %10 = tpu.concatenate %9, %8 in 0 : vector<4x32xf32>, vector<8x32xf32> -> vector<12x32xf32>
    %11 = arith.truncf %10 : vector<12x32xf32> to vector<12x32xbf16>
    %12 = vector.extract_strided_slice %11 {offsets = [0, 0], sizes = [8, 32], strides = [1, 1]} : vector<12x32xbf16> to vector<8x32xbf16>
    %c0_8 = arith.constant 0 : index
    %c0_9 = arith.constant 0 : index
    %c0_10 = arith.constant 0 : index
    %13 = vector.load %arg4[%c0_8, %c0_9, %c0_10] : memref<5x32x128xbf16, #tpu.memory_space<vmem>>, vector<1x32x128xbf16>
    %14 = vector.shape_cast %13 : vector<1x32x128xbf16> to vector<32x128xbf16>
    %cst = arith.constant dense<0.000000e+00> : vector<8x128xf32>
    %15 = tpu.matmul %12, %14, %cst {dimension_numbers = #tpu.dot_dimension_numbers<[1], [0], [0], [1], [0, 0, 1, 1], [], []>} : vector<8x32xbf16>, vector<32x128xbf16>, vector<8x128xf32> -> vector<8x128xf32>
    %16 = vector.extract_strided_slice %11 {offsets = [1, 0], sizes = [8, 32], strides = [1, 1]} : vector<12x32xbf16> to vector<8x32xbf16>
    %c1 = arith.constant 1 : index
    %c0_11 = arith.constant 0 : index
    %c0_12 = arith.constant 0 : index
    %17 = vector.load %arg4[%c1, %c0_11, %c0_12] : memref<5x32x128xbf16, #tpu.memory_space<vmem>>, vector<1x32x128xbf16>
    %18 = vector.shape_cast %17 : vector<1x32x128xbf16> to vector<32x128xbf16>
    %cst_13 = arith.constant dense<0.000000e+00> : vector<8x128xf32>
    %19 = tpu.matmul %16, %18, %cst_13 {dimension_numbers = #tpu.dot_dimension_numbers<[1], [0], [0], [1], [0, 0, 1, 1], [], []>} : vector<8x32xbf16>, vector<32x128xbf16>, vector<8x128xf32> -> vector<8x128xf32>
    %20 = arith.addf %15, %19 : vector<8x128xf32>
    %21 = vector.extract_strided_slice %11 {offsets = [2, 0], sizes = [8, 32], strides = [1, 1]} : vector<12x32xbf16> to vector<8x32xbf16>
    %c2 = arith.constant 2 : index
    %c0_14 = arith.constant 0 : index
    %c0_15 = arith.constant 0 : index
    %22 = vector.load %arg4[%c2, %c0_14, %c0_15] : memref<5x32x128xbf16, #tpu.memory_space<vmem>>, vector<1x32x128xbf16>
    %23 = vector.shape_cast %22 : vector<1x32x128xbf16> to vector<32x128xbf16>
    %cst_16 = arith.constant dense<0.000000e+00> : vector<8x128xf32>
    %24 = tpu.matmul %21, %23, %cst_16 {dimension_numbers = #tpu.dot_dimension_numbers<[1], [0], [0], [1], [0, 0, 1, 1], [], []>} : vector<8x32xbf16>, vector<32x128xbf16>, vector<8x128xf32> -> vector<8x128xf32>
    %25 = arith.addf %20, %24 : vector<8x128xf32>
    %26 = vector.extract_strided_slice %11 {offsets = [3, 0], sizes = [8, 32], strides = [1, 1]} : vector<12x32xbf16> to vector<8x32xbf16>
    %c3 = arith.constant 3 : index
    %c0_17 = arith.constant 0 : index
    %c0_18 = arith.constant 0 : index
    %27 = vector.load %arg4[%c3, %c0_17, %c0_18] : memref<5x32x128xbf16, #tpu.memory_space<vmem>>, vector<1x32x128xbf16>
    %28 = vector.shape_cast %27 : vector<1x32x128xbf16> to vector<32x128xbf16>
    %cst_19 = arith.constant dense<0.000000e+00> : vector<8x128xf32>
    %29 = tpu.matmul %26, %28, %cst_19 {dimension_numbers = #tpu.dot_dimension_numbers<[1], [0], [0], [1], [0, 0, 1, 1], [], []>} : vector<8x32xbf16>, vector<32x128xbf16>, vector<8x128xf32> -> vector<8x128xf32>
    %30 = arith.addf %25, %29 : vector<8x128xf32>
    %31 = vector.extract_strided_slice %11 {offsets = [4, 0], sizes = [8, 32], strides = [1, 1]} : vector<12x32xbf16> to vector<8x32xbf16>
    %c4 = arith.constant 4 : index
    %c0_20 = arith.constant 0 : index
    %c0_21 = arith.constant 0 : index
    %32 = vector.load %arg4[%c4, %c0_20, %c0_21] : memref<5x32x128xbf16, #tpu.memory_space<vmem>>, vector<1x32x128xbf16>
    %33 = vector.shape_cast %32 : vector<1x32x128xbf16> to vector<32x128xbf16>
    %cst_22 = arith.constant dense<0.000000e+00> : vector<8x128xf32>
    %34 = tpu.matmul %31, %33, %cst_22 {dimension_numbers = #tpu.dot_dimension_numbers<[1], [0], [0], [1], [0, 0, 1, 1], [], []>} : vector<8x32xbf16>, vector<32x128xbf16>, vector<8x128xf32> -> vector<8x128xf32>
    %35 = arith.addf %30, %34 : vector<8x128xf32>
    %c0_23 = arith.constant 0 : index
    %c0_24 = arith.constant 0 : index
    %36 = vector.load %arg5[%c0_23, %c0_24] : memref<1x128xf32, #tpu.memory_space<vmem>>, vector<1x128xf32>
    %37 = vector.shape_cast %36 : vector<1x128xf32> to vector<128xf32>
    %38 = vector.shape_cast %37 : vector<128xf32> to vector<1x128xf32>
    %39 = vector.broadcast %38 : vector<1x128xf32> to vector<8x128xf32>
    %40 = arith.addf %35, %39 : vector<8x128xf32>
    %cst_25 = arith.constant 0.000000e+00 : f32
    %41 = vector.broadcast %cst_25 : f32 to vector<8x128xf32>
    %42 = arith.maximumf %40, %41 : vector<8x128xf32>
    %c0_26 = arith.constant 0 : index
    %c0_27 = arith.constant 0 : index
    %43 = vector.load %arg12[%c0_26, %c0_27] : memref<4x128xf32, #tpu.memory_space<vmem>>, vector<4x128xf32>
    %44 = tpu.concatenate %43, %42 in 0 : vector<4x128xf32>, vector<8x128xf32> -> vector<12x128xf32>
    %45 = arith.truncf %44 : vector<12x128xf32> to vector<12x128xbf16>
    %46 = vector.extract_strided_slice %45 {offsets = [0, 0], sizes = [8, 128], strides = [1, 1]} : vector<12x128xbf16> to vector<8x128xbf16>
    %c0_28 = arith.constant 0 : index
    %c0_29 = arith.constant 0 : index
    %c0_30 = arith.constant 0 : index
    %47 = vector.load %arg6[%c0_28, %c0_29, %c0_30] : memref<5x128x128xbf16, #tpu.memory_space<vmem>>, vector<1x128x128xbf16>
    %48 = vector.shape_cast %47 : vector<1x128x128xbf16> to vector<128x128xbf16>
    %cst_31 = arith.constant dense<0.000000e+00> : vector<8x128xf32>
    %49 = tpu.matmul %46, %48, %cst_31 {dimension_numbers = #tpu.dot_dimension_numbers<[1], [0], [0], [1], [0, 0, 1, 1], [], []>} : vector<8x128xbf16>, vector<128x128xbf16>, vector<8x128xf32> -> vector<8x128xf32>
    %50 = vector.extract_strided_slice %45 {offsets = [1, 0], sizes = [8, 128], strides = [1, 1]} : vector<12x128xbf16> to vector<8x128xbf16>
    %c1_32 = arith.constant 1 : index
    %c0_33 = arith.constant 0 : index
    %c0_34 = arith.constant 0 : index
    %51 = vector.load %arg6[%c1_32, %c0_33, %c0_34] : memref<5x128x128xbf16, #tpu.memory_space<vmem>>, vector<1x128x128xbf16>
    %52 = vector.shape_cast %51 : vector<1x128x128xbf16> to vector<128x128xbf16>
    %cst_35 = arith.constant dense<0.000000e+00> : vector<8x128xf32>
    %53 = tpu.matmul %50, %52, %cst_35 {dimension_numbers = #tpu.dot_dimension_numbers<[1], [0], [0], [1], [0, 0, 1, 1], [], []>} : vector<8x128xbf16>, vector<128x128xbf16>, vector<8x128xf32> -> vector<8x128xf32>
    %54 = arith.addf %49, %53 : vector<8x128xf32>
    %55 = vector.extract_strided_slice %45 {offsets = [2, 0], sizes = [8, 128], strides = [1, 1]} : vector<12x128xbf16> to vector<8x128xbf16>
    %c2_36 = arith.constant 2 : index
    %c0_37 = arith.constant 0 : index
    %c0_38 = arith.constant 0 : index
    %56 = vector.load %arg6[%c2_36, %c0_37, %c0_38] : memref<5x128x128xbf16, #tpu.memory_space<vmem>>, vector<1x128x128xbf16>
    %57 = vector.shape_cast %56 : vector<1x128x128xbf16> to vector<128x128xbf16>
    %cst_39 = arith.constant dense<0.000000e+00> : vector<8x128xf32>
    %58 = tpu.matmul %55, %57, %cst_39 {dimension_numbers = #tpu.dot_dimension_numbers<[1], [0], [0], [1], [0, 0, 1, 1], [], []>} : vector<8x128xbf16>, vector<128x128xbf16>, vector<8x128xf32> -> vector<8x128xf32>
    %59 = arith.addf %54, %58 : vector<8x128xf32>
    %60 = vector.extract_strided_slice %45 {offsets = [3, 0], sizes = [8, 128], strides = [1, 1]} : vector<12x128xbf16> to vector<8x128xbf16>
    %c3_40 = arith.constant 3 : index
    %c0_41 = arith.constant 0 : index
    %c0_42 = arith.constant 0 : index
    %61 = vector.load %arg6[%c3_40, %c0_41, %c0_42] : memref<5x128x128xbf16, #tpu.memory_space<vmem>>, vector<1x128x128xbf16>
    %62 = vector.shape_cast %61 : vector<1x128x128xbf16> to vector<128x128xbf16>
    %cst_43 = arith.constant dense<0.000000e+00> : vector<8x128xf32>
    %63 = tpu.matmul %60, %62, %cst_43 {dimension_numbers = #tpu.dot_dimension_numbers<[1], [0], [0], [1], [0, 0, 1, 1], [], []>} : vector<8x128xbf16>, vector<128x128xbf16>, vector<8x128xf32> -> vector<8x128xf32>
    %64 = arith.addf %59, %63 : vector<8x128xf32>
    %65 = vector.extract_strided_slice %45 {offsets = [4, 0], sizes = [8, 128], strides = [1, 1]} : vector<12x128xbf16> to vector<8x128xbf16>
    %c4_44 = arith.constant 4 : index
    %c0_45 = arith.constant 0 : index
    %c0_46 = arith.constant 0 : index
    %66 = vector.load %arg6[%c4_44, %c0_45, %c0_46] : memref<5x128x128xbf16, #tpu.memory_space<vmem>>, vector<1x128x128xbf16>
    %67 = vector.shape_cast %66 : vector<1x128x128xbf16> to vector<128x128xbf16>
    %cst_47 = arith.constant dense<0.000000e+00> : vector<8x128xf32>
    %68 = tpu.matmul %65, %67, %cst_47 {dimension_numbers = #tpu.dot_dimension_numbers<[1], [0], [0], [1], [0, 0, 1, 1], [], []>} : vector<8x128xbf16>, vector<128x128xbf16>, vector<8x128xf32> -> vector<8x128xf32>
    %69 = arith.addf %64, %68 : vector<8x128xf32>
    %c0_48 = arith.constant 0 : index
    %c0_49 = arith.constant 0 : index
    %70 = vector.load %arg7[%c0_48, %c0_49] : memref<1x128xf32, #tpu.memory_space<vmem>>, vector<1x128xf32>
    %71 = vector.shape_cast %70 : vector<1x128xf32> to vector<128xf32>
    %72 = vector.shape_cast %71 : vector<128xf32> to vector<1x128xf32>
    %73 = vector.broadcast %72 : vector<1x128xf32> to vector<8x128xf32>
    %74 = arith.addf %69, %73 : vector<8x128xf32>
    %cst_50 = arith.constant 0.000000e+00 : f32
    %75 = vector.broadcast %cst_50 : f32 to vector<8x128xf32>
    %76 = arith.maximumf %74, %75 : vector<8x128xf32>
    %77 = arith.truncf %76 : vector<8x128xf32> to vector<8x128xbf16>
    %c0_51 = arith.constant 0 : index
    %c0_52 = arith.constant 0 : index
    %78 = vector.load %arg8[%c0_51, %c0_52] : memref<128x128xbf16, #tpu.memory_space<vmem>>, vector<128x128xbf16>
    %cst_53 = arith.constant dense<0.000000e+00> : vector<8x128xf32>
    %79 = tpu.matmul %77, %78, %cst_53 {dimension_numbers = #tpu.dot_dimension_numbers<[1], [0], [0], [1], [0, 0, 1, 1], [], []>} : vector<8x128xbf16>, vector<128x128xbf16>, vector<8x128xf32> -> vector<8x128xf32>
    %c0_54 = arith.constant 0 : index
    %c0_55 = arith.constant 0 : index
    %80 = vector.load %arg9[%c0_54, %c0_55] : memref<1x128xf32, #tpu.memory_space<vmem>>, vector<1x128xf32>
    %81 = vector.shape_cast %80 : vector<1x128xf32> to vector<128xf32>
    %82 = vector.shape_cast %81 : vector<128xf32> to vector<1x128xf32>
    %83 = vector.broadcast %82 : vector<1x128xf32> to vector<8x128xf32>
    %84 = arith.addf %79, %83 : vector<8x128xf32>
    %c0_56 = arith.constant 0 : index
    %c0_57 = arith.constant 0 : index
    %c0_58 = arith.constant 0 : index
    %85 = vector.load %arg10[%c0_56, %c0_57, %c0_58] : memref<1x8x128xf32, #tpu.memory_space<vmem>>, vector<1x8x128xf32>
    %86 = vector.shape_cast %85 : vector<1x8x128xf32> to vector<8x128xf32>
    %87 = vector.shape_cast %84 : vector<8x128xf32> to vector<1x8x128xf32>
    tpu.vector_store %arg10[%c0_56, %c0_57, %c0_58], %87 {strides = array<i32>} : memref<1x8x128xf32, #tpu.memory_space<vmem>>, vector<1x8x128xf32>,
    %88 = vector.extract_strided_slice %8 {offsets = [4, 0], sizes = [4, 32], strides = [1, 1]} : vector<8x32xf32> to vector<4x32xf32>
    %c0_59 = arith.constant 0 : index
    %c0_60 = arith.constant 0 : index
    %89 = vector.load %arg11[%c0_59, %c0_60] : memref<4x32xf32, #tpu.memory_space<vmem>>, vector<4x32xf32>
    tpu.vector_store %arg11[%c0_59, %c0_60], %88 {strides = array<i32>} : memref<4x32xf32, #tpu.memory_space<vmem>>, vector<4x32xf32>,
    %90 = vector.extract_strided_slice %42 {offsets = [4, 0], sizes = [4, 128], strides = [1, 1]} : vector<8x128xf32> to vector<4x128xf32>
    %c0_61 = arith.constant 0 : index
    %c0_62 = arith.constant 0 : index
    %91 = vector.load %arg12[%c0_61, %c0_62] : memref<4x128xf32, #tpu.memory_space<vmem>>, vector<4x128xf32>
    tpu.vector_store %arg12[%c0_61, %c0_62], %90 {strides = array<i32>} : memref<4x128xf32, #tpu.memory_space<vmem>>, vector<4x128xf32>,
    return
  }
  func.func @transform_0(%arg0: i32, %arg1: i32) -> (i32, i32, i32) {
    %c0_i32 = arith.constant 0 : i32
    %c0_i32_0 = arith.constant 0 : i32
    return %arg0, %arg1, %c0_i32 : i32, i32, i32
  }
  func.func @transform_1(%arg0: i32, %arg1: i32) -> (i32, i32, i32) {
    %c0_i32 = arith.constant 0 : i32
    %c0_i32_0 = arith.constant 0 : i32
    return %arg0, %arg1, %c0_i32 : i32, i32, i32
  }
  func.func @transform_2(%arg0: i32, %arg1: i32) -> (i32, i32, i32) {
    %c0_i32 = arith.constant 0 : i32
    %c0_i32_0 = arith.constant 0 : i32
    %c0_i32_1 = arith.constant 0 : i32
    %c0_i32_2 = arith.constant 0 : i32
    return %c0_i32, %c0_i32_0, %c0_i32_1 : i32, i32, i32
  }
  func.func @transform_3(%arg0: i32, %arg1: i32) -> (i32, i32) {
    %c0_i32 = arith.constant 0 : i32
    %c0_i32_0 = arith.constant 0 : i32
    %c0_i32_1 = arith.constant 0 : i32
    return %c0_i32, %c0_i32_0 : i32, i32
  }
  func.func @transform_4(%arg0: i32, %arg1: i32) -> (i32, i32, i32) {
    %c0_i32 = arith.constant 0 : i32
    %c0_i32_0 = arith.constant 0 : i32
    %c0_i32_1 = arith.constant 0 : i32
    %c0_i32_2 = arith.constant 0 : i32
    return %c0_i32, %c0_i32_0, %c0_i32_1 : i32, i32, i32
  }
  func.func @transform_5(%arg0: i32, %arg1: i32) -> (i32, i32) {
    %c0_i32 = arith.constant 0 : i32
    %c0_i32_0 = arith.constant 0 : i32
    %c0_i32_1 = arith.constant 0 : i32
    return %c0_i32, %c0_i32_0 : i32, i32
  }
  func.func @transform_6(%arg0: i32, %arg1: i32) -> (i32, i32) {
    %c0_i32 = arith.constant 0 : i32
    %c0_i32_0 = arith.constant 0 : i32
    %c0_i32_1 = arith.constant 0 : i32
    return %c0_i32, %c0_i32_0 : i32, i32
  }
  func.func @transform_7(%arg0: i32, %arg1: i32) -> (i32, i32) {
    %c0_i32 = arith.constant 0 : i32
    %c0_i32_0 = arith.constant 0 : i32
    %c0_i32_1 = arith.constant 0 : i32
    return %c0_i32, %c0_i32_0 : i32, i32
  }
  func.func @transform_8(%arg0: i32, %arg1: i32) -> (i32, i32, i32) {
    %c0_i32 = arith.constant 0 : i32
    %c0_i32_0 = arith.constant 0 : i32
    return %arg0, %arg1, %c0_i32 : i32, i32, i32
  }
}

</mosaic_0001>

<bundles_post_ra>
// kernel: cnn_adapter_forward.1
= control target key start
LH: loop header
LB: loop body
LE: loop exit
PB: predicated region body
PF: predicated region fallthrough
CT: control target
= control target key end

     0   :  { %s2556_s0 = inlined_call_operand.vmem [shape: f32[2,8,1], index: 0, kind: input, shape index: {}]   ;;  %s2557_s1 = inlined_call_operand.vmem [shape: f32[2,8,32], index: 1, kind: input, shape index: {}]   ;;  %s2558_s2 = inlined_call_operand.hbm [shape: bf16[5,32,128], index: 2, kind: input, shape index: {}]   ;;  %s2559_s3 = inlined_call_operand.vmem [shape: f32[1,128], index: 3, kind: input, shape index: {}]   ;;  %s2560_s4 = inlined_call_operand.hbm [shape: bf16[5,128,128], index: 4, kind: input, shape index: {}]   ;;  %s2561_s5 = inlined_call_operand.vmem [shape: f32[1,128], index: 5, kind: input, shape index: {}]   ;;  %s2562_s6 = inlined_call_operand.hbm [shape: bf16[128,128], index: 6, kind: input, shape index: {}]   ;;  %s2563_s7 = inlined_call_operand.vmem [shape: f32[1,128], index: 7, kind: input, shape index: {}]   ;;  %s2564_s8 = inlined_call_operand.hbm [shape: f32[2,8,128], index: 8, kind: output, shape index: {}]  }
   0x1   :  { %2573 = sst [smem:[#allocation19_spill]] %s2560_s4 }
   0x2   :  { %13 = vsyncpa [#allocation5], 0 }
   0x3   :  { %14 = vsyncpa [#allocation8], 0 }
   0x4   :  { %15 = vsyncpa [#allocation6], 0 }
   0x5   :  { %17 = vsyncpa [#allocation6 + $0x1], 0  ;;  %s2241_s27 = smov 0   ;;  %s2243_s28 = smov 0  }
   0x6   :  { %s2245_s29 = smov 0   ;;  %s2247_s30 = smov 0  }
   0x7   :  { %s2249_s9 = smov 0   ;;  %s2251_s10 = smov 0  }
   0x8 LB: > { %2574 = sst [smem:[#allocation14_spill]] %s2173_s29  ;;  %s1552_s11 = sadd.s32 4294967295, %s2185_s10   ;;  %s2185_s10 = sphi %s2251_s10, %s23_s10   ;;  %s2181_s9 = sphi %s2249_s9, %s2594_s9   ;;  %s2177_s30 = sphi %s2247_s30, %s2593_s30   ;;  %s2173_s29 = sphi %s2245_s29, %s2597_s29   ;;  %s2169_s28 = sphi %s2243_s28, %s2596_s28   ;;  %s2165_s27 = sphi %s2241_s27, %s2595_s27  }
   0x9   : > { %2575 = sst [smem:[#allocation15_spill]] %s2181_s9  ;;  %s1553_s12 = sadd.s32 4294967294, %s2185_s10  }
   0xa   : > { %s35_s13 = sadd.s32 1, %s2181_s9  ;;  %s226_s14 = sadd.s32 1, %s2173_s29 }
   0xb   : > { %p37_p0 = scmp.ge.s32.totalorder %s35_s13, 2  ;;  %p236_p1 = scmp.ne.s32.totalorder %s2173_s29, %s2169_s28 }
   0xc   : > { %p237_p2 = scmp.eq.s32.totalorder %s1552_s11, 1  ;;  %p242_p3 = scmp.ne.s32.totalorder %s2169_s28, %s2165_s27 }
   0xd   : > { %s2599_s13 = smov (%p37_p0, %s35_s13), 0  ;;  %p243_p5 = scmp.eq.s32.totalorder %s1553_s12, 1 }
   0xe   : > { %2576 = sst [smem:[#allocation16_spill]] %s2599_s13  ;;  %p2281_p4 = por %p237_p2, %p236_p1 }
   0xf   : > { %s221_s16 = ssub.s32 %s2181_s9, %s2599_s13  ;;  %p1554_p6 = scmp.ge.s32.totalorder %s2185_s10, 1 }
  0x10   : > { %s2577_s15 = scalar_select %p2281_p4, 1, 0 }
  0x11   : > { %p224_p7 = scmp.eq.s32.totalorder %s221_s16, 0  ;;  %p2288_p8 = por %p243_p5, %p242_p3 }
  0x12   : > { %p250_p9 = scmp.lt.s32.totalorder %s2185_s10, 3  ;;  %p2300_p11 = scmp.eq.s32.totalorder %s1552_s11, 0 }
  0x13   : > { %s2578_s17 = scalar_select %p2288_p8, 1, 0 }
  0x14   : > { %s2294_s18 = scalar_select %p224_p7, %s2173_s29, %s226_s14  }
  0x15   : > { %2579 = sst [smem:[#allocation17_spill]] %s2578_s17  ;;  %p2296_p10 = pnand %p1554_p6, %p250_p9 }
  0x16   : > { %2580 = sst [smem:[#allocation18_spill]] %s2294_s18  ;;  %s2187_s21 = smov [#allocation7]  }
  0x17   : > { %s2581_s19 = scalar_select %p2296_p10, 1, 0 }
  0x18   : > { %s2582_s20 = scalar_select %p2300_p11, 1, 0 }
  0x19   : > { %p1879_p12 = pneg %p2296_p10  ;;  %s278_s22 = sshll.u32 %s2187_s21, 4  ;;  %s279_s22 = int_to_ptr.vmem [resolvable:$true] %s278_s22 }
  0x1a   : > { %s2188_s24 = smov [#allocation4]   ;;  %s2584_s4 = sld [smem:[#allocation19_spill]] }
  0x1b   : > { %p2308_p13 = pnand %p2300_p11, %p1879_p12  ;;  %s262_s25 = sshll.u32 %s2188_s24, 4  ;;  %s263_s25 = int_to_ptr.vmem [resolvable:$true] %s262_s25 }
  0x1d   : > { %p2320_p1 = pneg %p2308_p13 }
  0x20   : > { %s2015_s11 = scalar_lea.hbm %s2584_s4, 5120 }
  0x21   : > { %p2016_p0 = scmp.ne.s32.totalorder %s2584_s4, %s2015_s11  ;;  %p2022_p5 = scmp.lt.u32.totalorder %s2015_s11, %s2584_s4 }
  0x23   : > { %p2018_p2 = pnand %p2320_p1, %p2016_p0 }
  0x25   : > { %p2019_p3 = pneg %p2018_p2 }
  0x27   : > { %p2024_p6 = pnand %p2022_p5, %p2019_p3 }
  0x29   : > { %2027 = shalt.err (!%p2024_p6)
}
  0x2a   : > { %s2028_s24 = scalar_lea.vmem %s279_s22, 5120  ;;  %p2036_p8 = scmp.lt.s32.totalorder %s279_s22, %s279_s22 }
  0x2b   : > { %p2029_p7 = scmp.ne.s32.totalorder %s279_s22, %s2028_s24  ;;  %p2037_p4 = scmp.lt.s32.totalorder %s2028_s24, %s2028_s24 }
  0x2d   : > { %p2031_p9 = pnand %p2029_p7, %p2320_p1  ;;  %p2038_p11 = por %p2037_p4, %p2036_p8 }
  0x2f   : > { %p2032_p12 = pneg %p2031_p9 }
  0x31   : > { %p2039_p10 = pnand %p2038_p11, %p2032_p12 }
  0x33   : > { %2042 = shalt.err (!%p2039_p10)
}
  0x34   : > { %s2189_s26 = smov 64   ;;  %s2190_s12 = smov 4  }
  0x35   : > { %1885 = dma.hbm_to_vmem [thread:$0]  (!%p2308_p13), %s2584_s4, 5120, %s279_s22, [#allocation8], %s2189_s26, %s2189_s26, %s2190_s12  }
  0x36   : > { %s2043_s16 = scalar_lea.hbm %s2558_s2, 1280 }
  0x37   : > { %p2044_p4 = scmp.ne.s32.totalorder %s2558_s2, %s2043_s16  ;;  %p2050_p11 = scmp.lt.u32.totalorder %s2043_s16, %s2558_s2 }
  0x39   : > { %p2046_p8 = pnand %p2044_p4, %p2320_p1 }
  0x3b   : > { %p2047_p10 = pneg %p2046_p8 }
  0x3d   : > { %p2052_p0 = pnand %p2050_p11, %p2047_p10 }
  0x3f   : > { %2055 = shalt.err (!%p2052_p0)
}
  0x40   : > { %s2056_s9 = scalar_lea.vmem %s263_s25, 1280  ;;  %p2064_p6 = scmp.lt.s32.totalorder %s263_s25, %s263_s25 }
  0x41   : > { %p2057_p2 = scmp.ne.s32.totalorder %s263_s25, %s2056_s9  ;;  %p2065_p7 = scmp.lt.s32.totalorder %s2056_s9, %s2056_s9 }
  0x43   : > { %p2059_p3 = pnand %p2057_p2, %p2320_p1  ;;  %p2066_p9 = por %p2065_p7, %p2064_p6 }
  0x45   : > { %p2060_p5 = pneg %p2059_p3 }
  0x47   : > { %p2067_p12 = pnand %p2066_p9, %p2060_p5 }
  0x49   : > { %2070 = shalt.err (!%p2067_p12)
}
  0x4a   : > { %1882 = dma.hbm_to_vmem [thread:$0]  (!%p2308_p13), %s2558_s2, 1280, %s263_s25, [#allocation5], %s2189_s26, %s2189_s26, %s2190_s12  }
  0x4b   : > { %s2191_s18 = smov [#allocation9]   ;;  %s2071_s14 = scalar_lea.hbm %s2562_s6, 1024 }
  0x4c   : > { %s294_s22 = sshll.u32 %s2191_s18, 4  ;;  %p2072_p4 = scmp.ne.s32.totalorder %s2562_s6, %s2071_s14  ;;  %s295_s22 = int_to_ptr.vmem [resolvable:$true] %s294_s22 }
  0x4d   : > { %p2078_p11 = scmp.lt.u32.totalorder %s2071_s14, %s2562_s6 }
  0x4e   : > { %p2074_p8 = pnand %p2072_p4, %p2320_p1 }
  0x50   : > { %p2075_p10 = pneg %p2074_p8 }
  0x52   : > { %p2080_p0 = pnand %p2078_p11, %p2075_p10 }
  0x54   : > { %2083 = shalt.err (!%p2080_p0)
}
  0x55   : > { %s2084_s25 = scalar_lea.vmem %s295_s22, 1024  ;;  %p2092_p6 = scmp.lt.s32.totalorder %s295_s22, %s295_s22 }
  0x56   : > { %p2085_p2 = scmp.ne.s32.totalorder %s295_s22, %s2084_s25  ;;  %p2093_p7 = scmp.lt.s32.totalorder %s2084_s25, %s2084_s25 }
  0x58   : > { %p2087_p3 = pnand %p2085_p2, %p2320_p1  ;;  %p2094_p9 = por %p2093_p7, %p2092_p6 }
  0x5a   : > { %p2088_p5 = pneg %p2087_p3 }
  0x5c   : > { %p2095_p12 = pnand %p2094_p9, %p2088_p5 }
  0x5e   : > { %2098 = shalt.err (!%p2095_p12)
}
  0x5f   : > { %1888 = dma.hbm_to_vmem [thread:$0]  (!%p2308_p13), %s2562_s6, 1024, %s295_s22, [#allocation8], %s2189_s26, %s2189_s26, %s2190_s12  }
  0x60   : > { %p2586_p4 = scmp.ne.s32.totalorder %s2581_s19, 0 }
  0x61   : > { %p2587_p1 = scmp.ne.s32.totalorder (!%p2586_p4), %s2582_s20, 0 }
  0x62   : > { %333 = sbr.rel (%p2586_p4) target bundleno = 1013 (0x3f5), region = 52 }
  0x69   : > { %2152 = dma.done.wait (%p2587_p1), [#allocation5], 1280  }
  0x6a   : > { %2154 = vsyncadd (%p2587_p1), [#allocation5], 4294966016 }
  0x6b   : > { %2156 = dma.done.wait (%p2587_p1), [#allocation8], 6144  }
  0x6c   : > { %2158 = vsyncadd (%p2587_p1), [#allocation8], 4294961152  ;;  %p384_p8 = scmp.lt.s32.totalorder %s2177_s30, 1  ;;  %vm403_vm0 = vcmask 257024   ;;  %v2192_v0 = vmov 0   ;;  %v2193_v1 = vmov 0.0  }
  0x6d   : > { %1956 = vset.pattern.permute.xlu0 %v2192_v0  ;;  %1713 = vmatprep.subr.bf16.mxu1 %v2193_v1  ;;  %405 = vst [vmem:[#allocation3] sm:$0xf] %v2193_v1  ;;  %404 = vst.msk [vmem:[#allocation2] sm:$0xf] %vm403_vm0, %v2193_v1  ;;  %v1957_v3 = vld [vmem:[#allocation4] sm:$0xff]   ;;  %v1958_v4 = vld [vmem:[#allocation4 + $0x8] sm:$0xff]  }
  0x6e   : > { %s385_s19 = scalar_select %p384_p8, %s2177_s30, 1  ;;  %1705 = vmatprep.subr.bf16.mxu0 %v2193_v1  ;;  %1714 = vmatpush3.bf16.msra.mxu1 %v1957_v3  ;;  %v1959_v5 = vld [vmem:[#allocation4 + $0x10] sm:$0xff]   ;;  %vm2194_vm1 = vmmov 0   ;;  %v1961_v6 = vld [vmem:[#allocation4 + $0x18] sm:$0xff]   ;;  %vm1417_vm2 = vcmask 261124   ;;  %vm418_vm3 = vcmask 1043456  }
  0x6f   : > { %1715 = vmatprep.subr.bf16.mxu1 %v2193_v1  ;;  %1706 = vmatpush3.bf16.msra.mxu0 %v1959_v5  ;;  %vm449_vm4 = vcmask 261120   ;;  %v1960_v13 = vld [vmem:[#allocation4 + $0x30] sm:$0xff]   ;;  %v1962_v17 = vld [vmem:[#allocation4 + $0x38] sm:$0xff]   ;;  %v1963_v21 = vld [vmem:[#allocation4 + $0x20] sm:$0xff]   ;;  %s381_s16 = sand.u32 1, %s2169_s28   ;;  %s1633_s4 = sshll.u32 %s2177_s30, 7 }
  0x70   : > { %s1564_s23 = sshll.u32 %s385_s19, 3  ;;  %1717 = vmatprep.mubr.msk.bf16.mxu1 %vm2194_vm1, %v2193_v1  ;;  %1707 = vmatprep.subr.bf16.mxu0 %v2193_v1  ;;  %v1964_v24 = vld [vmem:[#allocation4 + $0x28] sm:$0xff]   ;;  %v1965_v25 = vld [vmem:[#allocation4 + $0x40] sm:$0xff]   ;;  %v1967_v29 = vld [vmem:[#allocation7] sm:$0xff]   ;;  %s1563_s24 = sshll.u32 %s381_s16, 3 }
  0x71   : > { %s390_s26 = scalar_lea.vmem %s2556_s0, %s1564_s23  ;;  %1709 = vmatprep.mubr.msk.bf16.mxu0 %vm2194_vm1, %v2193_v1  ;;  %s397_s18 = scalar_lea.vmem %s2557_s1, %s1564_s23  ;;  %v1966_v27 = vld [vmem:[#allocation4 + $0x48] sm:$0xff]   ;;  %v1968_v30 = vld [vmem:[#allocation7 + $0x8] sm:$0xff]   ;;  %v1969_v31 = vld [vmem:[#allocation7 + $0x40] sm:$0xff]  }
  0x72   : > { %v407_v2 = vld [vmem:[%s390_s26] sm:$0xff]  ;;  %1716 = vmatpush3.bf16.msra.mxu1 %v1958_v4  ;;  %v1970_v32 = vld [vmem:[#allocation7 + $0x10] sm:$0xff]   ;;  %v1972_v34 = vld [vmem:[#allocation7 + $0x18] sm:$0xff]   ;;  %s383_s29 = scalar_lea.vmem [#allocation10], %s1563_s24  ;;  %s2509_s20 = scalar_lea.hbm %s2564_s8, %s1633_s4 }
  0x73   : > { %410 = vperm.xlu0 %1956, %v407_v2   ;;  %1729 = vmatprep.subr.bf16.mxu1 %v2193_v1  ;;  %v406_v7 = vld [vmem:[%s397_s18] sm:$0xff]  ;;  %v1973_v35 = vld [vmem:[#allocation7 + $0x50] sm:$0xff]   ;;  %v1974_v36 = vld [vmem:[#allocation7 + $0x20] sm:$0xff]   ;;  %s1435_s19 = sshll.u32 %s383_s29, 4  ;;  %s1421_s26 = scalar_lea.sflag [#allocation6], %s381_s16  ;;  %s2511_s19 = int_to_ptr.vmem [resolvable:$true] %s1435_s19 }
  0x74   : > { %1708 = vmatpush3.bf16.msra.mxu0 %v1961_v6  ;;  %v414_v9 = vld [vmem:[#allocation2] sm:$0xf]  ;;  %v1975_v37 = vld [vmem:[#allocation7 + $0x58] sm:$0xff]   ;;  %v1977_v39 = vld [vmem:[#allocation7 + $0x60] sm:$0xff]   ;;  %s2099_s30 = scalar_lea.vmem %s2511_s19, 128  ;;  %p2588_p10 = scmp.ne.s32.totalorder %s2577_s15, 0 }
  0x75   : > { %1721 = vmatprep.subr.bf16.mxu0 %v2193_v1  ;;  %v1971_v33 = vld [vmem:[#allocation7 + $0x48] sm:$0xff]   ;;  %v1978_v40 = vld [vmem:[#allocation7 + $0x30] sm:$0xff]   ;;  %v1980_v42 = vld [vmem:[#allocation7 + $0x38] sm:$0xff]   ;;  %p2100_p13 = scmp.ne.s32.totalorder %s2511_s19, %s2099_s30  ;;  %s2195_s12 = smov [#allocation10]  }
  0x76   : > { %v1976_v38 = vld [vmem:[#allocation7 + $0x28] sm:$0xff]   ;;  %v1981_v43 = vld [vmem:[#allocation7 + $0x70] sm:$0xff]   ;;  %v1983_v44 = vld [vmem:[#allocation7 + $0x78] sm:$0xff]   ;;  %s2103_s17 = sshll.u32 %s2195_s12, 4  ;;  %s2104_s17 = int_to_ptr.vmem [resolvable:$false] %s2103_s17 }
  0x77   : > { %v1979_v41 = vld [vmem:[#allocation7 + $0x68] sm:$0xff]   ;;  %p2101_p11 = pnand %p2100_p13, %p2588_p10  ;;  %s2105_s18 = scalar_lea.vmem %s2104_s17, 256 }
  0x78   : > { %v1581_v2 = vld [vmem:[%s2559_s3] ss:$0 sm:$0xff]  ;;  %p2106_p2 = scmp.lt.s32.totalorder %s2511_s19, %s2104_s17  ;;  %p2107_p3 = scmp.lt.s32.totalorder %s2105_s18, %s2099_s30 }
  0x79   : > { %p2102_p0 = pneg %p2101_p11 }
  0x7a   : > { %p2108_p5 = por %p2107_p3, %p2106_p2 }
  0x7c   : > { %p2109_p6 = pnand %p2108_p5, %p2102_p0 }
  0xf2   : > { %v411_v8 = vpop.permute.xlu0 %410 }
  0xf3   : > { %v413_v10 = vmul.f32 %v411_v8, %v406_v7  ;;  %v745_v8 = vld [vmem:[#allocation3] sm:$0xf] }
  0xf5   : > { %v416_v11 = vrot.slane %v413_v10, 4  ;;  %1418 = vst.msk [vmem:[#allocation2 - $0x4] sm:$0xf0] %vm1417_vm2, %v413_v10 }
  0xf7   : > { %v419_v12 = vsel %vm418_vm3, %v414_v9, %v416_v11 }
  0xf8   : > { %v420_v14 = vpack.c.bf16 %v416_v11, %v419_v12  ;;  %v1982_v12 = vld [vmem:[#allocation7 + $0xc0] sm:$0xff]  }
  0xfa   : > { %1718 = vmatmul.mubr.msk.bf16.vlgmr.msra.gmra.mrb[0].mxu1 %vm449_vm4, %v420_v14  ;;  %v431_v15 = vshrl.u32 %v420_v14, 16  ;;  %v433_v16 = vshll.u32 %v420_v14, 16  ;;  %v553_v26 = vrot.slane %v420_v14, 1  ;;  %v679_v28 = vrot.slane %v420_v14, 2 }
  0xfb   : > { %1730 = vmatpush3.bf16.msra.mxu1 %v1960_v13  ;;  %1733 = vmatprep.mubr.msk.bf16.mxu1 %vm2194_vm1, %v2193_v1 }
  0xfc   : > { %1731 = vmatprep.subr.bf16.mxu1 %v2193_v1  ;;  %v435_v18 = vrot.slane %v433_v16, 1  ;;  %v615_v19 = vrot.slane %v431_v15, 1  ;;  %v616_v20 = vrot.slane %v433_v16, 2 }
  0xfe   : > { %v436_v22 = vor.u32 %v435_v18, %v431_v15  ;;  %v617_v23 = vor.u32 %v616_v20, %v615_v19  ;;  %v1984_v15 = vld [vmem:[#allocation7 + $0xc8] sm:$0xff]   ;;  %v1985_v18 = vld [vmem:[#allocation7 + $0x80] sm:$0xff]   ;;  %v1986_v20 = vld [vmem:[#allocation7 + $0xd0] sm:$0xff]  }
  0xff   : > { %1732 = vmatpush3.bf16.msra.mxu1 %v1962_v17 }
 0x100   : > { %1710 = vmatmul.mubr.msk.bf16.vlgmr.msra.gmra.mrb[0].mxu0 %vm449_vm4, %v436_v22  ;;  %1745 = vmatprep.subr.bf16.mxu1 %v2193_v1  ;;  %v1988_v22 = vld [vmem:[#allocation7 + $0xd8] sm:$0xff]  }
 0x101   : > { %1722 = vmatpush3.bf16.msra.mxu0 %v1963_v21  ;;  %1725 = vmatprep.mubr.msk.bf16.mxu0 %vm2194_vm1, %v2193_v1  ;;  %v1987_v21 = vld [vmem:[#allocation7 + $0x88] sm:$0xff]  }
 0x102   : > { %1734 = vmatmul.mubr.msk.bf16.vlgmr.msra.gmra.mrb[4].mxu1 %vm449_vm4, %v617_v23  ;;  %1723 = vmatprep.subr.bf16.mxu0 %v2193_v1  ;;  %v1989_v23 = vld [vmem:[#allocation7 + $0x90] sm:$0xff]  }
 0x103   : > { %1761 = vmatprep.mubr.msk.bf16.mxu1 %vm2194_vm1, %v2193_v1  ;;  %1746 = vmatpush3.bf16.msra.mxu1 %v1969_v31 }
 0x104   : > { %1747 = vmatprep.subr.bf16.mxu1 %v2193_v1 }
 0x105   : > { %1724 = vmatpush3.bf16.msra.mxu0 %v1964_v24  ;;  %v1990_v24 = vld [vmem:[#allocation7 + $0xe0] sm:$0xff]  }
 0x106   : > { %1737 = vmatprep.subr.bf16.mxu0 %v2193_v1 }
 0x107   : > { %1748 = vmatpush3.bf16.msra.mxu1 %v1971_v33  ;;  %v1997_v33 = vld [vmem:[#allocation7 + $0xb0] sm:$0xff]  }
 0x108   : > { %1726 = vmatmul.mubr.msk.bf16.vlgmr.msra.gmra.mrb[4].mxu0 %vm449_vm4, %v553_v26  ;;  %1749 = vmatprep.subr.bf16.mxu1 %v2193_v1  ;;  %v1992_v26 = vld [vmem:[#allocation7 + $0xe8] sm:$0xff]  }
 0x109   : > { %1738 = vmatpush3.bf16.msra.mxu0 %v1965_v25  ;;  %1741 = vmatprep.mubr.msk.bf16.mxu0 %vm2194_vm1, %v2193_v1  ;;  %v1991_v25 = vld [vmem:[#allocation7 + $0x98] sm:$0xff]  }
 0x10a   : > { %1739 = vmatprep.subr.bf16.mxu0 %v2193_v1 }
 0x10b   : > { %1750 = vmatpush3.bf16.msra.mxu1 %v1973_v35  ;;  %v1998_v35 = vld [vmem:[#allocation7 + $0xb8] sm:$0xff]  }
 0x10c   : > { %1751 = vmatprep.subr.bf16.mxu1 %v2193_v1 }
 0x10d   : > { %1740 = vmatpush3.bf16.msra.mxu0 %v1966_v27  ;;  %v1993_v27 = vld [vmem:[#allocation7 + $0xa0] sm:$0xff]  }
 0x10e   : > { %1765 = vmatprep.subr.bf16.mxu0 %v2193_v1 }
 0x10f   : > { %1752 = vmatpush3.bf16.msra.mxu1 %v1975_v37 }
 0x110   : > { %1742 = vmatmul.mubr.msk.bf16.vlgmr.msra.gmra.mrb[8].mxu0 %vm449_vm4, %v679_v28  ;;  %1753 = vmatprep.subr.bf16.mxu1 %v2193_v1  ;;  %v1994_v28 = vld [vmem:[#allocation7 + $0xf0] sm:$0xff]  }
 0x111   : > { %1781 = vmatprep.mubr.msk.bf16.mxu0 %vm2194_vm1, %v2193_v1  ;;  %1766 = vmatpush3.bf16.msra.mxu0 %v1967_v29  ;;  %v1995_v29 = vld [vmem:[#allocation7 + $0xa8] sm:$0xff]  }
 0x112   : > { %1767 = vmatprep.subr.bf16.mxu0 %v2193_v1 }
 0x113   : > { %1754 = vmatpush3.bf16.msra.mxu1 %v1977_v39  ;;  %v2001_v39 = vld [vmem:[#allocation7 + $0x110] sm:$0xff]  }
 0x114   : > { %1755 = vmatprep.subr.bf16.mxu1 %v2193_v1 }
 0x115   : > { %1768 = vmatpush3.bf16.msra.mxu0 %v1968_v30  ;;  %v1996_v30 = vld [vmem:[#allocation7 + $0xf8] sm:$0xff]  }
 0x116   : > { %1769 = vmatprep.subr.bf16.mxu0 %v2193_v1 }
 0x117   : > { %1756 = vmatpush3.bf16.msra.mxu1 %v1979_v41  ;;  %v2003_v41 = vld [vmem:[#allocation7 + $0x120] sm:$0xff]  }
 0x118   : > { %1757 = vmatprep.subr.bf16.mxu1 %v2193_v1 }
 0x119   : > { %1770 = vmatpush3.bf16.msra.mxu0 %v1970_v32 }
 0x11a   : > { %1771 = vmatprep.subr.bf16.mxu0 %v2193_v1 }
 0x11b   : > { %1758 = vmatpush3.bf16.msra.mxu1 %v1981_v43  ;;  %v2005_v43 = vld [vmem:[#allocation7 + $0x130] sm:$0xff]  }
 0x11c   : > { %1759 = vmatprep.subr.bf16.mxu1 %v2193_v1 }
 0x11d   : > { %1772 = vmatpush3.bf16.msra.mxu0 %v1972_v34 }
 0x11e   : > { %1773 = vmatprep.subr.bf16.mxu0 %v2193_v1 }
 0x11f   : > { %1760 = vmatpush3.bf16.msra.mxu1 %v1983_v44  ;;  %v2006_v44 = vld [vmem:[#allocation7 + $0x138] sm:$0xff]  }
 0x120   : > { %1785 = vmatprep.subr.bf16.mxu1 %v2193_v1 }
 0x121   : > { %1774 = vmatpush3.bf16.msra.mxu0 %v1974_v36  ;;  %v1999_v36 = vld [vmem:[#allocation7 + $0x100] sm:$0xff]  }
 0x122   : > { %1775 = vmatprep.subr.bf16.mxu0 %v2193_v1 }
 0x125   : > { %1776 = vmatpush3.bf16.msra.mxu0 %v1976_v38  ;;  %v2000_v38 = vld [vmem:[#allocation7 + $0x108] sm:$0xff]  }
 0x126   : > { %1777 = vmatprep.subr.bf16.mxu0 %v2193_v1 }
 0x129   : > { %1778 = vmatpush3.bf16.msra.mxu0 %v1978_v40  ;;  %v2002_v40 = vld [vmem:[#allocation7 + $0x118] sm:$0xff]  }
 0x12a   : > { %1779 = vmatprep.subr.bf16.mxu0 %v2193_v1 }
 0x12d   : > { %1780 = vmatpush3.bf16.msra.mxu0 %v1980_v42  ;;  %v2004_v42 = vld [vmem:[#allocation7 + $0x128] sm:$0xff]  }
 0x12e   : > { %1805 = vmatprep.subr.bf16.mxu0 %v2193_v1 }
 0x1cd   : > { %v541_v45 = vpop.f32.mrb[0].mxu1 }
 0x1ce   : > { %v1719_v46 = vpop.f32.mrb[1].mxu1 }
 0x1cf   : > { %v544_v47 = vpop.f32.mrb[2].mxu1  ;;  %v2007_v46 = vld [vmem:[#allocation9] sm:$0xff]  }
 0x1d0   : > { %v1720_v48 = vpop.f32.mrb[3].mxu1  ;;  %v2008_v47 = vld [vmem:[#allocation9 + $0x8] sm:$0xff]  }
 0x1d1   : > { %v2009_v48 = vld [vmem:[#allocation9 + $0x10] sm:$0xff]  }
 0x1d3   : > { %v487_v49 = vpop.f32.mrb[0].mxu0 }
 0x1d4   : > { %v542_v50 = vadd.f32 %v541_v45, %v487_v49  ;;  %v1711_v51 = vpop.f32.mrb[1].mxu0  ;;  %v2010_v49 = vld [vmem:[#allocation9 + $0x18] sm:$0xff]  }
 0x1d5   : > { %v490_v52 = vpop.f32.mrb[2].mxu0  ;;  %v667_v53 = vpop.f32.mrb[4].mxu1  ;;  %v2012_v51 = vld [vmem:[#allocation9 + $0x28] sm:$0xff]  }
 0x1d6   : > { %v1712_v54 = vpop.f32.mrb[3].mxu0  ;;  %v1735_v55 = vpop.f32.mrb[5].mxu1  ;;  %v2013_v52 = vld [vmem:[#allocation9 + $0x30] sm:$0xff]  }
 0x1d7   : > { %v670_v56 = vpop.f32.mrb[6].mxu1 }
 0x1d8   : > { %v1736_v57 = vpop.f32.mrb[7].mxu1 }
 0x1db   : > { %v603_v58 = vpop.f32.mrb[4].mxu0 }
 0x1dc   : > { %v609_v59 = vadd.f32 %v603_v58, %v542_v50  ;;  %v1727_v60 = vpop.f32.mrb[5].mxu0  ;;  %v2011_v50 = vld [vmem:[#allocation9 + $0x20] sm:$0xff]  }
 0x1dd   : > { %v606_v61 = vpop.f32.mrb[6].mxu0 }
 0x1de   : > { %v1728_v62 = vpop.f32.mrb[7].mxu0  ;;  %v673_v63 = vadd.f32 %v667_v53, %v609_v59  ;;  %v2014_v53 = vld [vmem:[#allocation9 + $0x38] sm:$0xff]  }
 0x1e3   : > { %v729_v0 = vpop.f32.mrb[8].mxu0 }
 0x1e4   : > { %v735_v3 = vadd.f32 %v729_v0, %v673_v63  ;;  %v1743_v4 = vpop.f32.mrb[9].mxu0 }
 0x1e5   : > { %v732_v5 = vpop.f32.mrb[10].mxu0 }
 0x1e6   : > { %v743_v6 = vadd.f32 %v1581_v2, %v735_v3  ;;  %v1744_v7 = vpop.f32.mrb[11].mxu0 }
 0x1e8   : > { %v744_v9 = vmax.f32 %v743_v6, 0.0 }
 0x1ea   : > { %v747_v10 = vrot.slane %v744_v9, 4  ;;  %1419 = vst [vmem:[#allocation3 - $0x4] sm:$0xf0] %v744_v9 }
 0x1ec   : > { %v749_v11 = vsel %vm418_vm3, %v745_v8, %v747_v10 }
 0x1ed   : > { %v2453_v13 = vpack.c.bf16 %v747_v10, %v749_v11  ;;  %v1622_v10 = vld [vmem:[%s2561_s5] ss:$0 sm:$0xff] }
 0x1ef   : > { %1782 = vmatmul.mubr.bf16.vlgmr.msra.gmra.mrb[12].mxu0 %v2453_v13  ;;  %v787_v14 = vshll.u32 %v2453_v13, 16  ;;  %v785_v16 = vshrl.u32 %v2453_v13, 16  ;;  %v986_v37 = vrot.slane %v2453_v13, 1  ;;  %v1204_v45 = vrot.slane %v2453_v13, 2 }
 0x1f0   : > { %1806 = vmatpush3.bf16.msra.mxu0 %v1982_v12  ;;  %1821 = vmatprep.mubr.msk.bf16.mxu0 %vm2194_vm1, %v2193_v1 }
 0x1f1   : > { %1807 = vmatprep.subr.bf16.mxu0 %v2193_v1  ;;  %v789_v17 = vrot.slane %v787_v14, 1  ;;  %v1094_v31 = vrot.slane %v785_v16, 1  ;;  %v1095_v32 = vrot.slane %v787_v14, 2 }
 0x1f3   : > { %v790_v19 = vor.u32 %v789_v17, %v785_v16  ;;  %v1096_v34 = vor.u32 %v1095_v32, %v1094_v31 }
 0x1f4   : > { %1808 = vmatpush3.bf16.msra.mxu0 %v1984_v15 }
 0x1f5   : > { %1762 = vmatmul.mubr.bf16.vlgmr.msra.gmra.mrb[8].mxu1 %v790_v19  ;;  %1809 = vmatprep.subr.bf16.mxu0 %v2193_v1 }
 0x1f6   : > { %1786 = vmatpush3.bf16.msra.mxu1 %v1985_v18  ;;  %1801 = vmatprep.mubr.msk.bf16.mxu1 %vm2194_vm1, %v2193_v1  ;;  %v1623_v18 = vld [vmem:[%s2563_s7] ss:$0 sm:$0xff] }
 0x1f7   : > { %1787 = vmatprep.subr.bf16.mxu1 %v2193_v1 }
 0x1f8   : > { %1810 = vmatpush3.bf16.msra.mxu0 %v1986_v20 }
 0x1f9   : > { %1811 = vmatprep.subr.bf16.mxu0 %v2193_v1 }
 0x1fa   : > { %1788 = vmatpush3.bf16.msra.mxu1 %v1987_v21 }
 0x1fb   : > { %1789 = vmatprep.subr.bf16.mxu1 %v2193_v1 }
 0x1fc   : > { %1812 = vmatpush3.bf16.msra.mxu0 %v1988_v22 }
 0x1fd   : > { %1813 = vmatprep.subr.bf16.mxu0 %v2193_v1 }
 0x1fe   : > { %1790 = vmatpush3.bf16.msra.mxu1 %v1989_v23 }
 0x1ff   : > { %1791 = vmatprep.subr.bf16.mxu1 %v2193_v1 }
 0x200   : > { %1814 = vmatpush3.bf16.msra.mxu0 %v1990_v24 }
 0x201   : > { %1815 = vmatprep.subr.bf16.mxu0 %v2193_v1 }
 0x202   : > { %1792 = vmatpush3.bf16.msra.mxu1 %v1991_v25 }
 0x203   : > { %1793 = vmatprep.subr.bf16.mxu1 %v2193_v1 }
 0x204   : > { %1816 = vmatpush3.bf16.msra.mxu0 %v1992_v26 }
 0x205   : > { %1817 = vmatprep.subr.bf16.mxu0 %v2193_v1 }
 0x206   : > { %1794 = vmatpush3.bf16.msra.mxu1 %v1993_v27 }
 0x207   : > { %1795 = vmatprep.subr.bf16.mxu1 %v2193_v1 }
 0x208   : > { %1818 = vmatpush3.bf16.msra.mxu0 %v1994_v28 }
 0x209   : > { %1819 = vmatprep.subr.bf16.mxu0 %v2193_v1 }
 0x20a   : > { %1796 = vmatpush3.bf16.msra.mxu1 %v1995_v29 }
 0x20b   : > { %1797 = vmatprep.subr.bf16.mxu1 %v2193_v1 }
 0x20c   : > { %1820 = vmatpush3.bf16.msra.mxu0 %v1996_v30 }
 0x20d   : > { %1845 = vmatprep.subr.bf16.mxu0 %v2193_v1 }
 0x20e   : > { %1798 = vmatpush3.bf16.msra.mxu1 %v1997_v33 }
 0x20f   : > { %1822 = vmatmul.mubr.bf16.vlgmr.msra.gmra.mrb[16].mxu0 %v1096_v34  ;;  %1799 = vmatprep.subr.bf16.mxu1 %v2193_v1 }
 0x210   : > { %1861 = vmatprep.mubr.msk.bf16.mxu0 %vm2194_vm1, %v2193_v1  ;;  %1846 = vmatpush3.bf16.msra.mxu0 %v2007_v46 }
 0x211   : > { %1847 = vmatprep.subr.bf16.mxu0 %v2193_v1 }
 0x212   : > { %1800 = vmatpush3.bf16.msra.mxu1 %v1998_v35 }
 0x213   : > { %1825 = vmatprep.subr.bf16.mxu1 %v2193_v1 }
 0x214   : > { %1848 = vmatpush3.bf16.msra.mxu0 %v2008_v47 }
 0x215   : > { %1802 = vmatmul.mubr.bf16.vlgmr.msra.gmra.mrb[12].mxu1 %v986_v37  ;;  %1849 = vmatprep.subr.bf16.mxu0 %v2193_v1 }
 0x216   : > { %1826 = vmatpush3.bf16.msra.mxu1 %v1999_v36  ;;  %1841 = vmatprep.mubr.msk.bf16.mxu1 %vm2194_vm1, %v2193_v1 }
 0x217   : > { %1827 = vmatprep.subr.bf16.mxu1 %v2193_v1 }
 0x218   : > { %1850 = vmatpush3.bf16.msra.mxu0 %v2009_v48 }
 0x219   : > { %1851 = vmatprep.subr.bf16.mxu0 %v2193_v1 }
 0x21a   : > { %1828 = vmatpush3.bf16.msra.mxu1 %v2000_v38 }
 0x21b   : > { %1829 = vmatprep.subr.bf16.mxu1 %v2193_v1 }
 0x21c   : > { %1852 = vmatpush3.bf16.msra.mxu0 %v2010_v49 }
 0x21d   : > { %1853 = vmatprep.subr.bf16.mxu0 %v2193_v1 }
 0x21e   : > { %1830 = vmatpush3.bf16.msra.mxu1 %v2001_v39 }
 0x21f   : > { %1831 = vmatprep.subr.bf16.mxu1 %v2193_v1 }
 0x220   : > { %1854 = vmatpush3.bf16.msra.mxu0 %v2011_v50 }
 0x221   : > { %1855 = vmatprep.subr.bf16.mxu0 %v2193_v1 }
 0x222   : > { %1832 = vmatpush3.bf16.msra.mxu1 %v2002_v40 }
 0x223   : > { %1833 = vmatprep.subr.bf16.mxu1 %v2193_v1 }
 0x224   : > { %1856 = vmatpush3.bf16.msra.mxu0 %v2012_v51 }
 0x225   : > { %1857 = vmatprep.subr.bf16.mxu0 %v2193_v1 }
 0x226   : > { %1834 = vmatpush3.bf16.msra.mxu1 %v2003_v41 }
 0x227   : > { %1835 = vmatprep.subr.bf16.mxu1 %v2193_v1 }
 0x228   : > { %1858 = vmatpush3.bf16.msra.mxu0 %v2013_v52 }
 0x229   : > { %1859 = vmatprep.subr.bf16.mxu0 %v2193_v1 }
 0x22a   : > { %1836 = vmatpush3.bf16.msra.mxu1 %v2004_v42 }
 0x22b   : > { %1837 = vmatprep.subr.bf16.mxu1 %v2193_v1 }
 0x22c   : > { %1860 = vmatpush3.bf16.msra.mxu0 %v2014_v53 }
 0x22e   : > { %1838 = vmatpush3.bf16.msra.mxu1 %v2005_v43 }
 0x22f   : > { %1839 = vmatprep.subr.bf16.mxu1 %v2193_v1 }
 0x232   : > { %1840 = vmatpush3.bf16.msra.mxu1 %v2006_v44 }
 0x235   : > { %1842 = vmatmul.mubr.bf16.vlgmr.msra.gmra.mrb[16].mxu1 %v1204_v45 }
 0x2c2   : > { %v962_v54 = vpop.f32.mrb[12].mxu0 }
 0x2c3   : > { %v1783_v55 = vpop.f32.mrb[13].mxu0 }
 0x2c4   : > { %v965_v56 = vpop.f32.mrb[14].mxu0 }
 0x2c5   : > { %v1784_v57 = vpop.f32.mrb[15].mxu0 }
 0x2c8   : > { %v874_v58 = vpop.f32.mrb[8].mxu1 }
 0x2c9   : > { %v963_v59 = vadd.f32 %v962_v54, %v874_v58  ;;  %v1763_v60 = vpop.f32.mrb[9].mxu1 }
 0x2ca   : > { %v877_v61 = vpop.f32.mrb[10].mxu1 }
 0x2cb   : > { %v1764_v62 = vpop.f32.mrb[11].mxu1 }
 0x2e2   : > { %v1180_v63 = vpop.f32.mrb[16].mxu0 }
 0x2e3   : > { %v1823_v0 = vpop.f32.mrb[17].mxu0 }
 0x2e4   : > { %v1183_v2 = vpop.f32.mrb[18].mxu0 }
 0x2e5   : > { %v1824_v3 = vpop.f32.mrb[19].mxu0 }
 0x2e8   : > { %v1070_v4 = vpop.f32.mrb[12].mxu1 }
 0x2e9   : > { %v1076_v5 = vadd.f32 %v1070_v4, %v963_v59  ;;  %v1803_v6 = vpop.f32.mrb[13].mxu1 }
 0x2ea   : > { %v1073_v1 = vpop.f32.mrb[14].mxu1 }
 0x2eb   : > { %v1804_v7 = vpop.f32.mrb[15].mxu1  ;;  %v1186_v8 = vadd.f32 %v1180_v63, %v1076_v5 }
 0x308   : > { %v1288_v9 = vpop.f32.mrb[16].mxu1 }
 0x309   : > { %v1294_v11 = vadd.f32 %v1288_v9, %v1186_v8  ;;  %v1843_v12 = vpop.f32.mrb[17].mxu1 }
 0x30a   : > { %v1291_v13 = vpop.f32.mrb[18].mxu1 }
 0x30b   : > { %v1302_v14 = vadd.f32 %v1622_v10, %v1294_v11  ;;  %v1844_v15 = vpop.f32.mrb[19].mxu1 }
 0x30d   : > { %v1303_v16 = vmax.f32 %v1302_v14, 0.0 }
 0x30f   : > { %v1304_v17 = vpack.c.bf16 %v1303_v16, %v1303_v16 }
 0x311   : > { %1862 = vmatmul.mubr.bf16.vlgmr.msra.gmra.mrb[20].mxu0 %v1304_v17 }
 0x3e4   : > { %v1410_v19 = vpop.f32.mrb[20].mxu0 }
 0x3e5   : > { %v1411_v20 = vadd.f32 %v1623_v18, %v1410_v19  ;;  %v1863_v21 = vpop.f32.mrb[21].mxu0 }
 0x3e6   : > { %v1413_v22 = vpop.f32.mrb[22].mxu0 }
 0x3e7   : > { %1416 = vst [vmem:[%s383_s29] sm:$0xff] %v1411_v20  ;;  %v1864_v23 = vpop.f32.mrb[23].mxu0 }
 0x3e8   : > { %2112 = shalt.err (!%p2109_p6)
}
 0x3e9   : > { %s2113_s22 = scalar_lea.hbm %s2509_s20, 128  ;;  %s2117_s14 = scalar_lea.hbm %s2564_s8, 256 }
 0x3ea   : > { %p2114_p7 = scmp.ne.s32.totalorder %s2509_s20, %s2113_s22  ;;  %p2118_p4 = scmp.lt.u32.totalorder %s2509_s20, %s2564_s8 }
 0x3eb   : > { %p2119_p1 = scmp.lt.u32.totalorder %s2117_s14, %s2113_s22  ;;  %p2121_p13 = scmp.lt.u32.totalorder %s2113_s22, %s2509_s20 }
 0x3ec   : > { %p2115_p9 = pnand %p2114_p7, %p2588_p10 }
 0x3ed   : > { %p2120_p8 = por %p2119_p1, %p2118_p4 }
 0x3ee   : > { %p2116_p12 = pneg %p2115_p9 }
 0x3ef   : > { %p2122_p11 = por %p2121_p13, %p2120_p8 }
 0x3f1   : > { %p2123_p0 = pnand %p2122_p11, %p2116_p12 }
 0x3f3   : > { %2126 = shalt.err (!%p2123_p0)
}
 0x3f4   : > { %1877 = dma.vmem_to_hbm [thread:$0]  (%p2588_p10), %s2511_s19, 128, %s2509_s20, %s1421_s26  }
 0x3f5 PF: > { %s2589_s9 = sld [smem:[#allocation17_spill]]  ;;  %p1899_p2 = scmp.ge.s32.totalorder %s2185_s10, 2 }
 0x3f6   : > { %s1447_s25 = sand.u32 1, %s2165_s27  }
 0x3f7   : > { %s1448_s4 = scalar_lea.sflag [#allocation6], %s1447_s25 }
 0x3fb   : > { %p2590_p3 = scmp.ne.s32.totalorder %s2589_s9, 0 }
 0x3fd   : > { %p1890_p5 = pnand %p1899_p2, %p2590_p3 }
 0x3ff   : > { %2160 = dma.done.wait (!%p1890_p5), %s1448_s4, 128  }
 0x400   : > { %2162 = vsyncadd (!%p1890_p5), %s1448_s4, 4294967168  ;;  %s23_s10 = sadd.s32 1, %s2185_s10   ;;  %s2591_s29 = sld [smem:[#allocation14_spill]] }
 0x401   : > { %p20_p6 = scmp.ge.s32.totalorder %s23_s10, 4   ;;  %s2592_s15 = sld [smem:[#allocation18_spill]] }
 0x402   : > { %s2593_s30 = sld [smem:[#allocation15_spill]]  ;;  %s2594_s9 = sld [smem:[#allocation16_spill]] }
 0x403   : > { %s2595_s27 = smov %s2169_s28  ;;  %22 = sbr.rel (!%p20_p6) target bundleno = 8 (0x8), region = 115 }
 0x406   : > { %s2596_s28 = smov %s2591_s29 }
 0x407   : > { %s2597_s29 = smov %s2592_s15 }
 0x40a   :  { %1453 = vsyncpa [#allocation5], 1 }
 0x40b   :  { %1455 = vsyncpa [#allocation5 + $0x1], 1 }
 0x40c   :  { %1456 = vsyncpa [#allocation8], 1 }
 0x40d   :  { %1457 = vsyncpa [#allocation6], 1 }
 0x40e   :  { %1459 = vsyncpa [#allocation6 + $0x1], 1 }

</bundles_post_ra>
